<compile_context>
chip_gen: v7x
topology: tpu7x:2x2x1
jax: 0.10.0
libtpu: 0.0.40
codegen_flags: <defaults>
</compile_context>

<pallas_src>
import jax
import jax.numpy as jnp
from jax.experimental import pallas as pl
from jax.experimental.pallas import tpu as pltpu


# 32K lanes/tile: ~1.1 MiB x-block, ~0.6 MiB out-block (double-buffered) plus
# the (7,TILE_B) f32 intermediate -> well under every generation's scoped VMEM.
MAX_TILE_B = 32 * 1024


def mlp_kernel(x_ref, w12_ref, b12_ref, w3_ref, b3_ref, o_ref):
    # x_ref: (9, TILE_B) -- batch rides the lane axis, features on sublanes.
    x = x_ref[...]                                                     # (9, TB)

    # Folded Linear(9,7)+Linear(7,7):  (7,9) @ (9,TB) + (7,1)
    h = jnp.dot(w12_ref[...], x, preferred_element_type=jnp.float32) + b12_ref[...]

    # LeakyReLU(negative_slope=0.2)  (VPU elementwise)
    h = jnp.where(h >= 0, h, 0.2 * h)

    # Linear(7,5):  (5,7) @ (7,TB) + (5,1)
    y = jnp.dot(w3_ref[...], h, preferred_element_type=jnp.float32) + b3_ref[...]

    # ReLU, lane-dense store of the (5, TILE_B) block.
    o_ref[...] = jnp.maximum(y, 0.0)


def _choose_tile_b(batch):
    """Lane-tile (multiple of 128), capped at MAX_TILE_B.

    Small B -> one padded tile; otherwise aim for >=2 grid steps so both
    v7x TensorCores get work, but never exceed the VMEM-safe cap.
    """
    if batch <= 256:
        return int(128 * pl.cdiv(batch, 128))
    tile = 128 * pl.cdiv(pl.cdiv(batch, 2), 128)
    return int(min(tile, MAX_TILE_B))


def forward_feature_major(xt, w12, b12, w3, b3):
    """Core Pallas call.  xt: (9, B) f32 -> (5, B) f32 (batch on lanes)."""
    B = xt.shape[1]
    tile_b = _choose_tile_b(B)
    grid = (pl.cdiv(B, tile_b),)

    # Tiny weights/biases: full arrays with constant index_map -> DMA'd once
    # and kept VMEM-resident across the batch grid.
    resident = lambda a: pl.BlockSpec(a.shape, lambda i: (0, 0))

    return pl.pallas_call(
        mlp_kernel,
        out_shape=jax.ShapeDtypeStruct((5, B), jnp.float32),
        grid=grid,
        in_specs=[
            pl.BlockSpec((9, tile_b), lambda i: (0, i)),   # streamed x tile
            resident(w12), resident(b12),
            resident(w3), resident(b3),
        ],
        out_specs=pl.BlockSpec((5, tile_b), lambda i: (0, i)),
        compiler_params=pltpu.CompilerParams(
            dimension_semantics=("parallel",),
        ),
    )(xt, w12, b12, w3, b3)


@jax.jit
def neural_network_forward(x, params):
    """PyTorch-contract entry point.  x: (B, 9) f32 -> (B, 5) f32."""
    # Fold the two activation-free Linears (tiny 7x9 / 7x1 work, done in-jit).
    w12 = params["w2"] @ params["w1"]                      # (7, 9)
    b12 = params["w2"] @ params["b1"] + params["b2"]       # (7, 1)
    out_t = forward_feature_major(x.T, w12, b12, params["w3"], params["b3"])
    return out_t.T


def init_params(key):
    """nn.Linear-style init.  Weights kept in PyTorch (out, in) orientation,
    biases as (out, 1) so they broadcast across lanes in the kernel."""
    ks = jax.random.split(key, 6)

    def linear(kw, kb, fan_in, fan_out):
        bound = 1.0 / jnp.sqrt(fan_in)
        w = jax.random.uniform(kw, (fan_out, fan_in), jnp.float32, -bound, bound)
        b = jax.random.uniform(kb, (fan_out, 1), jnp.float32, -bound, bound)
        return w, b

    w1, b1 = linear(ks[0], ks[1], 9, 7)
    w2, b2 = linear(ks[2], ks[3], 7, 7)
    w3, b3 = linear(ks[4], ks[5], 7, 5)
    return {"w1": w1, "b1": b1, "w2": w2, "b2": b2, "w3": w3, "b3": b3}


def reference_forward(x, p):
    h1 = x @ p["w1"].T + p["b1"][:, 0]
    h2 = h1 @ p["w2"].T + p["b2"][:, 0]
    h2 = jnp.where(h2 >= 0, h2, 0.2 * h2)
    h3 = h2 @ p["w3"].T + p["b3"][:, 0]
    return jnp.maximum(h3, 0.0)


if __name__ == "__main__":
    key = jax.random.PRNGKey(0)
    kx, kp = jax.random.split(key)

    # Small batch that still exercises 2 grid steps (tile=512) plus a ragged
    # (masked) last block of 488 lanes.
    B = 1000
    x = jax.random.normal(kx, (B, 9), jnp.float32)
    params = init_params(kp)

    out = neural_network_forward(x, params)
    out = jax.block_until_ready(out)

    ref = reference_forward(x, params)
    assert out.shape == (B, 5)
    assert jnp.allclose(out, ref, atol=1e-4, rtol=1e-5), float(jnp.abs(out - ref).max())

    print("KERNEL_OK")
</pallas_src>

<mosaic_0001>
module attributes {stable_mosaic.version = 11 : i64} {
  func.func @mlp_kernel(%arg0: i32, %arg1: memref<9x512xf32, #tpu.memory_space<vmem>>, %arg2: memref<7x9xf32, #tpu.memory_space<vmem>>, %arg3: memref<7x1xf32, #tpu.memory_space<vmem>>, %arg4: memref<5x7xf32, #tpu.memory_space<vmem>>, %arg5: memref<5x1xf32, #tpu.memory_space<vmem>>, %arg6: memref<5x512xf32, #tpu.memory_space<vmem>>) attributes {dimension_semantics = [#tpu.dimension_semantics<parallel>], iteration_bounds = array<i64: 2>, scalar_prefetch = 0 : i64, scratch_operands = 0 : i64, tpu.core_type = #tpu.core_type<tc>, window_params = [{transform_indices = @transform_0, window_bounds = array<i64: 9, 512>}, {pipeline_mode = #tpu.pipeline_mode<synchronous>, transform_indices = @transform_1, window_bounds = array<i64: 7, 9>}, {pipeline_mode = #tpu.pipeline_mode<synchronous>, transform_indices = @transform_2, window_bounds = array<i64: 7, 1>}, {pipeline_mode = #tpu.pipeline_mode<synchronous>, transform_indices = @transform_3, window_bounds = array<i64: 5, 7>}, {pipeline_mode = #tpu.pipeline_mode<synchronous>, transform_indices = @transform_4, window_bounds = array<i64: 5, 1>}, {transform_indices = @transform_5, window_bounds = array<i64: 5, 512>}]} {
    %c0 = arith.constant 0 : index
    %c0_0 = arith.constant 0 : index
    %0 = vector.load %arg1[%c0, %c0_0] : memref<9x512xf32, #tpu.memory_space<vmem>>, vector<9x512xf32>
    %c0_1 = arith.constant 0 : index
    %c0_2 = arith.constant 0 : index
    %1 = vector.load %arg2[%c0_1, %c0_2] : memref<7x9xf32, #tpu.memory_space<vmem>>, vector<7x9xf32>
    %cst = arith.constant dense<0.000000e+00> : vector<7x512xf32>
    %2 = tpu.matmul %1, %0, %cst {dimension_numbers = #tpu.dot_dimension_numbers<[1], [0], [0], [1], [0, 0, 1, 1], [], []>} : vector<7x9xf32>, vector<9x512xf32>, vector<7x512xf32> -> vector<7x512xf32>
    %c0_3 = arith.constant 0 : index
    %c0_4 = arith.constant 0 : index
    %3 = vector.load %arg3[%c0_3, %c0_4] : memref<7x1xf32, #tpu.memory_space<vmem>>, vector<7x1xf32>
    %4 = vector.broadcast %3 : vector<7x1xf32> to vector<7x512xf32>
    %5 = arith.addf %2, %4 : vector<7x512xf32>
    %cst_5 = arith.constant 0.000000e+00 : f32
    %6 = vector.broadcast %cst_5 : f32 to vector<7x512xf32>
    %7 = arith.cmpf oge, %5, %6 : vector<7x512xf32>
    %cst_6 = arith.constant 2.000000e-01 : f32
    %8 = vector.broadcast %cst_6 : f32 to vector<7x512xf32>
    %9 = arith.mulf %8, %5 : vector<7x512xf32>
    %10 = arith.select %7, %5, %9 : vector<7x512xi1>, vector<7x512xf32>
    %c0_7 = arith.constant 0 : index
    %c0_8 = arith.constant 0 : index
    %11 = vector.load %arg4[%c0_7, %c0_8] : memref<5x7xf32, #tpu.memory_space<vmem>>, vector<5x7xf32>
    %cst_9 = arith.constant dense<0.000000e+00> : vector<5x512xf32>
    %12 = tpu.matmul %11, %10, %cst_9 {dimension_numbers = #tpu.dot_dimension_numbers<[1], [0], [0], [1], [0, 0, 1, 1], [], []>} : vector<5x7xf32>, vector<7x512xf32>, vector<5x512xf32> -> vector<5x512xf32>
    %c0_10 = arith.constant 0 : index
    %c0_11 = arith.constant 0 : index
    %13 = vector.load %arg5[%c0_10, %c0_11] : memref<5x1xf32, #tpu.memory_space<vmem>>, vector<5x1xf32>
    %14 = vector.broadcast %13 : vector<5x1xf32> to vector<5x512xf32>
    %15 = arith.addf %12, %14 : vector<5x512xf32>
    %cst_12 = arith.constant 0.000000e+00 : f32
    %16 = vector.broadcast %cst_12 : f32 to vector<5x512xf32>
    %17 = arith.maximumf %15, %16 : vector<5x512xf32>
    %c0_13 = arith.constant 0 : index
    %c0_14 = arith.constant 0 : index
    %18 = vector.load %arg6[%c0_13, %c0_14] : memref<5x512xf32, #tpu.memory_space<vmem>>, vector<5x512xf32>
    tpu.vector_store %arg6[%c0_13, %c0_14], %17 {strides = array<i32>} : memref<5x512xf32, #tpu.memory_space<vmem>>, vector<5x512xf32>,
    return
  }
  func.func @transform_0(%arg0: i32) -> (i32, i32) {
    %c0_i32 = arith.constant 0 : i32
    %c0_i32_0 = arith.constant 0 : i32
    return %c0_i32, %arg0 : i32, i32
  }
  func.func @transform_1(%arg0: i32) -> (i32, i32) {
    %c0_i32 = arith.constant 0 : i32
    %c0_i32_0 = arith.constant 0 : i32
    %c0_i32_1 = arith.constant 0 : i32
    return %c0_i32, %c0_i32_0 : i32, i32
  }
  func.func @transform_2(%arg0: i32) -> (i32, i32) {
    %c0_i32 = arith.constant 0 : i32
    %c0_i32_0 = arith.constant 0 : i32
    %c0_i32_1 = arith.constant 0 : i32
    return %c0_i32, %c0_i32_0 : i32, i32
  }
  func.func @transform_3(%arg0: i32) -> (i32, i32) {
    %c0_i32 = arith.constant 0 : i32
    %c0_i32_0 = arith.constant 0 : i32
    %c0_i32_1 = arith.constant 0 : i32
    return %c0_i32, %c0_i32_0 : i32, i32
  }
  func.func @transform_4(%arg0: i32) -> (i32, i32) {
    %c0_i32 = arith.constant 0 : i32
    %c0_i32_0 = arith.constant 0 : i32
    %c0_i32_1 = arith.constant 0 : i32
    return %c0_i32, %c0_i32_0 : i32, i32
  }
  func.func @transform_5(%arg0: i32) -> (i32, i32) {
    %c0_i32 = arith.constant 0 : i32
    %c0_i32_0 = arith.constant 0 : i32
    return %c0_i32, %arg0 : i32, i32
  }
}

</mosaic_0001>

<bundles_post_ra>
// kernel: neural_network_forward.1
= control target key start
LH: loop header
LB: loop body
LE: loop exit
PB: predicated region body
PF: predicated region fallthrough
CT: control target
= control target key end

     0   :  { %10 = vsyncpa [#allocation3], 0  ;;  %s1110_s0 = inlined_call_operand.hbm [shape: f32[9,1000], index: 0, kind: input, shape index: {}]   ;;  %s1111_s1 = inlined_call_operand.vmem [shape: f32[7,9], index: 1, kind: input, shape index: {}]   ;;  %s1112_s2 = inlined_call_operand.vmem [shape: f32[7,1], index: 2, kind: input, shape index: {}]   ;;  %s1113_s3 = inlined_call_operand.vmem [shape: f32[5,7], index: 3, kind: input, shape index: {}]   ;;  %s1114_s4 = inlined_call_operand.vmem [shape: f32[5,1], index: 4, kind: input, shape index: {}]   ;;  %s1115_s5 = inlined_call_operand.hbm [shape: f32[5,1000], index: 5, kind: output, shape index: {}]  }
   0x1   :  { %12 = vsyncpa [#allocation3 + $0x1], 0 }
   0x2   :  { %13 = vsyncpa [#allocation4], 0 }
   0x3   :  { %15 = vsyncpa [#allocation4 + $0x1], 0  ;;  %s919_s18 = smov 0   ;;  %s921_s19 = smov 0  }
   0x4   :  { %s923_s20 = smov 0   ;;  %s925_s21 = smov 0  }
   0x5 LB: > { %s940_s22 = sadd.s32 4294967295, %s879_s21   ;;  %s690_s23 = sadd.s32 4294967294, %s879_s21   ;;  %s879_s21 = sphi %s925_s21, %s1131_s21   ;;  %s875_s20 = sphi %s923_s20, %s1130_s20   ;;  %s871_s19 = sphi %s921_s19, %s1129_s19   ;;  %s867_s18 = sphi %s919_s18, %s1128_s18  }
   0x6   : > { %s944_s24 = sadd.s32 1, %s879_s21   ;;  %s28_s25 = sadd.s32 1, %s875_s20 }
   0x7   : > { %s25_s26 = ssub.s32 %s879_s21, %s944_s24  ;;  %p35_p0 = scmp.ne.s32.totalorder %s875_s20, %s871_s19 }
   0x8   : > { %p26_p1 = scmp.eq.s32.totalorder %s25_s26, 0  ;;  %p36_p2 = scmp.eq.s32.totalorder %s879_s21, 0 }
   0x9   : > { %p41_p3 = scmp.ne.s32.totalorder %s871_s19, %s867_s18  ;;  %p42_p4 = scmp.eq.s32.totalorder %s940_s22, 0 }
   0xa   : > { %s956_s27 = scalar_select %p26_p1, %s875_s20, %s28_s25  }
   0xb   : > { %p958_p5 = por %p36_p2, %p35_p0  ;;  %p962_p6 = por %p42_p4, %p41_p3 }
   0xc   : > { %p149_p7 = scmp.eq.s32.totalorder %s940_s22, 1  ;;  %p155_p8 = scmp.eq.s32.totalorder %s690_s23, 1 }
   0xd   : > { %p742_p10 = scmp.lt.s32.totalorder %s879_s21, 2  ;;  %s187_s7 = sand.u32 1, %s875_s20  }
   0xe   : > { %p969_p11 = por %p149_p7, %p35_p0  ;;  %p973_p12 = por %p155_p8, %p41_p3 }
   0xf   : > { %s716_s8 = sshll.u32 %s879_s21, 9  ;;  %s693_s9 = sshll.u32 %s187_s7, 6 }
  0x10   : > { %s1119_s30 = scalar_select %p969_p11, 1, 0 }
  0x11   : > { %s1120_s6 = scalar_select %p973_p12, 1, 0 }
  0x12   : > { %s982_s12 = scalar_lea.hbm %s1110_s0, %s716_s8  ;;  %s191_s13 = scalar_lea.vmem [#allocation2], %s693_s9 }
  0x13   : > { %s198_s14 = sshll.u32 %s191_s13, 4  ;;  %p986_p13 = pnand %p742_p10, %p958_p5  ;;  %s990_s14 = int_to_ptr.vmem [resolvable:$true] %s198_s14 }
  0x14   : > { %s993_s16 = scalar_lea.sflag [#allocation3], %s187_s7  ;;  %s783_s17 = scalar_lea.hbm %s982_s12, 1024 }
  0x15   : > { %p784_p1 = scmp.ne.s32.totalorder %s982_s12, %s783_s17  ;;  %p785_p2 = pneg %p986_p13 }
  0x16   : > { %s788_s26 = scalar_lea.hbm %s1110_s0, 2048  ;;  %p789_p5 = scmp.lt.u32.totalorder %s982_s12, %s1110_s0 }
  0x17   : > { %p786_p3 = pnand %p785_p2, %p784_p1  ;;  %p790_p7 = scmp.lt.u32.totalorder %s788_s26, %s783_s17 }
  0x18   : > { %p792_p10 = scmp.lt.u32.totalorder %s783_s17, %s982_s12 }
  0x19   : > { %p787_p4 = pneg %p786_p3  ;;  %p791_p8 = por %p790_p7, %p789_p5 }
  0x1b   : > { %p793_p9 = por %p792_p10, %p791_p8 }
  0x1d   : > { %p794_p0 = pnand %p793_p9, %p787_p4 }
  0x1f   : > { %797 = shalt.err (!%p794_p0)
}
  0x20   : > { %s798_s7 = scalar_lea.vmem %s990_s14, 1024  ;;  %s881_s9 = smov [#allocation2]  }
  0x21   : > { %p799_p1 = scmp.ne.s32.totalorder %s990_s14, %s798_s7  ;;  %s803_s10 = sshll.u32 %s881_s9, 4  ;;  %s804_s10 = int_to_ptr.vmem [resolvable:$false] %s803_s10 }
  0x22   : > { %s805_s11 = scalar_lea.vmem %s804_s10, 2048  ;;  %p806_p11 = scmp.lt.s32.totalorder %s990_s14, %s804_s10 }
  0x23   : > { %p801_p3 = pnand %p799_p1, %p785_p2  ;;  %p807_p5 = scmp.lt.s32.totalorder %s805_s11, %s798_s7 }
  0x25   : > { %p802_p12 = pneg %p801_p3  ;;  %p808_p7 = por %p807_p5, %p806_p11 }
  0x27   : > { %p809_p8 = pnand %p808_p7, %p802_p12 }
  0x29   : > { %812 = shalt.err (!%p809_p8)
}
  0x2a   : > { %s882_s13 = smov 1024   ;;  %s883_s17 = smov 512  }
  0x2b   : > { %s884_s23 = smov 32   ;;  %p206_p9 = scmp.lt.s32.totalorder %s879_s21, 3 }
  0x2c   : > { %737 = dma.hbm_to_vmem [thread:$0]  (!%p986_p13), %s982_s12, 1024, %s990_s14, %s993_s16, %s882_s13, %s883_s17, %s884_s23  }
  0x2d   : > { %p1122_p0 = scmp.ge.s32.totalorder %s879_s21, 1 }
  0x2f   : > { %p207_p2 = pnand %p1122_p0, %p206_p9 }
  0x30   : > { %s1025_s25 = sand.u32 (!%p207_p2), 1, %s871_s19  }
  0x31   : > { %210 = sbr.rel (%p207_p2) target bundleno = 517 (0x205), region = 40  ;;  %s697_s26 = sshll.u32 (!%p207_p2), %s1025_s25, 6 }
  0x32   : > { %s213_s28 = scalar_lea.sflag (!%p207_p2), [#allocation3], %s1025_s25  ;;  %s216_s8 = scalar_lea.vmem (!%p207_p2), [#allocation2], %s697_s26 }
  0x38   : > { %858 = dma.done.wait (%p962_p6), %s213_s28, 1024  }
  0x39   : > { %860 = vsyncadd (%p962_p6), %s213_s28, 4294966272  ;;  %v885_v0 = vmov 0.0   ;;  %v886_v1 = vmov 0   ;;  %vm264_vm0 = vcmask 1040384   ;;  %vm887_vm1 = vmmov 1   ;;  %v246_v3 = vld [vmem:[%s216_s8 + $0x8] sm:$0xff] }
  0x3a   : > { %341 = vmatprep.mubr.f32.mxu0 %v885_v0  ;;  %412 = vmatprep.mubr.f32.mxu1 %v885_v0  ;;  %vm1033_vm2 = vmpackc.low %vm264_vm0, %vm887_vm1  ;;  %v250_v4 = vld [vmem:[%s216_s8 + $0x28] sm:$0x1]  ;;  %v248_v5 = vld [vmem:[%s216_s8 + $0x18] sm:$0xff]  ;;  %vm260_vm3 = vcmask 72704   ;;  %vm442_vm4 = vcmask 1046528   ;;  %vm438_vm9 = vcmask 56320  }
  0x3b   : > { %782 = vset.pattern.permute.xlu0 %v886_v1  ;;  %v718_v6 = vpack.c.bf16 %v250_v4, %v246_v3  ;;  %v252_v7 = vld [vmem:[%s216_s8 + $0x38] sm:$0x1]  ;;  %v245_v8 = vld [vmem:[%s216_s8] sm:$0xff]  ;;  %v247_v12 = vld [vmem:[%s216_s8 + $0x10] sm:$0xff]  ;;  %s698_s11 = sshll.u32 %s1025_s25, 5  ;;  %s717_s13 = sshll.u32 %s940_s22, 9 }
  0x3c   : > { %v249_v9 = vld [vmem:[%s216_s8 + $0x20] sm:$0x1]  ;;  %v724_v10 = vpack.c.bf16 %v252_v7, %v248_v5  ;;  %v251_v13 = vld [vmem:[%s216_s8 + $0x30] sm:$0x1]  ;;  %s242_s17 = scalar_lea.vmem [#allocation5], %s698_s11  ;;  %s1066_s8 = scalar_lea.hbm %s1115_s5, %s717_s13 }
  0x3d   : > { %v721_v11 = vpack.c.bf16 %v249_v9, %v245_v8  ;;  %720 = vmatprep.subr.msk.bf16.mxu0 %vm1033_vm2, %v718_v6  ;;  %v727_v14 = vpack.c.bf16 %v251_v13, %v247_v12  ;;  %v254_v15 = vld [vmem:[%s1112_s2] sm:$0x7f]  ;;  %s620_s23 = sshll.u32 %s242_s17, 4  ;;  %s606_s22 = scalar_lea.sflag [#allocation4], %s1025_s25  ;;  %s1068_s23 = int_to_ptr.vmem [resolvable:$true] %s620_s23 }
  0x3e   : > { %726 = vmatprep.subr.msk.bf16.mxu1 %vm1033_vm2, %v724_v10  ;;  %v253_v16 = vld [vmem:[%s1111_s1] sm:$0x7f]  ;;  %257 = vperm.xlu0 %782, %v254_v15   ;;  %s813_s29 = scalar_lea.vmem %s1068_s23, 512  ;;  %p1125_p11 = scmp.ne.s32.totalorder %s1119_s30, 0 }
  0x3f   : > { %723 = vmatpush1.bf16.msk.msra.mxu0 %vm1033_vm2, %v721_v11  ;;  %729 = vmatpush1.bf16.msk.msra.mxu1 %vm1033_vm2, %v727_v14  ;;  %v432_v17 = vld [vmem:[%s1114_s4] sm:$0x1f]  ;;  %p814_p6 = scmp.ne.s32.totalorder %s1068_s23, %s813_s29  ;;  %s888_s12 = smov [#allocation5]  }
  0x40   : > { %v431_v32 = vld [vmem:[%s1113_s3] sm:$0x1f]  ;;  %s817_s14 = sshll.u32 %s888_s12, 4  ;;  %s818_s14 = int_to_ptr.vmem [resolvable:$false] %s817_s14 }
  0x41   : > { %p815_p12 = pnand %p814_p6, %p1125_p11  ;;  %s819_s15 = scalar_lea.vmem %s818_s14, 1024 }
  0x42   : > { %701 = vmatmul.mubr.msk.f32.vlgmr.msra.gmra.mrb[0].mxu0 %vm260_vm3, %v253_v16  ;;  %704 = vmatmul.mubr.msk.f32.vlgmr.msra.gmra.mrb[0].mxu1 %vm260_vm3, %v253_v16  ;;  %p820_p4 = scmp.lt.s32.totalorder %s1068_s23, %s818_s14  ;;  %p821_p10 = scmp.lt.s32.totalorder %s819_s15, %s813_s29 }
  0x43   : > { %519 = vmatprep.mubr.f32.mxu0 %v885_v0  ;;  %435 = vperm.xlu0 %782, %v432_v17   ;;  %p816_p13 = pneg %p815_p12 }
  0x44   : > { %590 = vmatprep.mubr.f32.mxu1 %v885_v0  ;;  %p822_p1 = por %p821_p10, %p820_p4 }
  0x46   : > { %p823_p3 = pnand %p822_p1, %p816_p13 }
  0xbd   : > { %v258_v18 = vpop.permute.xlu0 %257 }
  0xc2   : > { %v436_v36 = vpop.permute.xlu0 %435 }
 0x115   : > { %v343_v19 = vpop.f32.mrb[0].mxu0  ;;  %v414_v21 = vpop.f32.mrb[0].mxu1 }
 0x116   : > { %v344_v20 = vadd.f32 %v343_v19, %v258_v18  ;;  %v345_v22 = vpop.f32.mrb[1].mxu0  ;;  %v415_v23 = vadd.f32 %v414_v21, %v258_v18  ;;  %v416_v25 = vpop.f32.mrb[1].mxu1 }
 0x117   : > { %v346_v24 = vadd.f32 %v345_v22, %v258_v18  ;;  %v417_v27 = vadd.f32 %v416_v25, %v258_v18 }
 0x118   : > { %v423_v26 = vmul.f32 0.2, %v344_v20  ;;  %vm419_vm5 = vcmp.ge.f32.partialorder %v344_v20, 0.0  ;;  %v425_v28 = vmul.f32 0.2, %v415_v23  ;;  %vm421_vm7 = vcmp.ge.f32.partialorder %v415_v23, 0.0 }
 0x119   : > { %vm420_vm6 = vcmp.ge.f32.partialorder %v346_v24, 0.0  ;;  %v424_v29 = vmul.f32 0.2, %v346_v24  ;;  %vm422_vm8 = vcmp.ge.f32.partialorder %v417_v27, 0.0  ;;  %v426_v30 = vmul.f32 0.2, %v417_v27 }
 0x11a   : > { %v427_v33 = vsel %vm419_vm5, %v344_v20, %v423_v26  ;;  %v429_v35 = vsel %vm421_vm7, %v415_v23, %v425_v28 }
 0x11b   : > { %v428_v31 = vsel %vm420_vm6, %v346_v24, %v424_v29  ;;  %v430_v34 = vsel %vm422_vm8, %v417_v27, %v426_v30 }
 0x11c   : > { %705 = vmatprep.subr.msk.mxu0 %vm442_vm4, %v428_v31  ;;  %708 = vmatprep.subr.msk.mxu1 %vm442_vm4, %v430_v34 }
 0x11d   : > { %706 = vmatpush1.msk.msra.mxu0 %vm442_vm4, %v427_v33  ;;  %709 = vmatpush1.msk.msra.mxu1 %vm442_vm4, %v429_v35 }
 0x11e   : > { %707 = vmatmul.mubr.msk.f32.vlgmr.msra.gmra.mrb[2].mxu0 %vm438_vm9, %v431_v32  ;;  %710 = vmatmul.mubr.msk.f32.vlgmr.msra.gmra.mrb[2].mxu1 %vm438_vm9, %v431_v32 }
 0x1f1   : > { %v521_v37 = vpop.f32.mrb[2].mxu0  ;;  %v592_v39 = vpop.f32.mrb[2].mxu1 }
 0x1f2   : > { %v522_v38 = vadd.f32 %v521_v37, %v436_v36  ;;  %v523_v40 = vpop.f32.mrb[3].mxu0  ;;  %v593_v41 = vadd.f32 %v592_v39, %v436_v36  ;;  %v594_v43 = vpop.f32.mrb[3].mxu1 }
 0x1f3   : > { %v524_v42 = vadd.f32 %v523_v40, %v436_v36  ;;  %v595_v45 = vadd.f32 %v594_v43, %v436_v36 }
 0x1f4   : > { %v597_v44 = vmax.f32 %v522_v38, 0.0  ;;  %v599_v46 = vmax.f32 %v593_v41, 0.0 }
 0x1f5   : > { %v598_v47 = vmax.f32 %v524_v42, 0.0  ;;  %v600_v48 = vmax.f32 %v595_v45, 0.0 }
 0x1f6   : > { %601 = vst [vmem:[%s242_s17] sm:$0x1f] %v597_v44  ;;  %603 = vst [vmem:[%s242_s17 + $0x10] sm:$0x1f] %v599_v46 }
 0x1f7   : > { %602 = vst [vmem:[%s242_s17 + $0x8] sm:$0x1f] %v598_v47  ;;  %604 = vst [vmem:[%s242_s17 + $0x18] sm:$0x1f] %v600_v48 }
 0x1f8   : > { %826 = shalt.err (!%p823_p3)
}
 0x1f9   : > { %s827_s25 = scalar_lea.hbm %s1066_s8, 512  ;;  %s831_s9 = scalar_lea.hbm %s1115_s5, 1024 }
 0x1fa   : > { %p828_p5 = scmp.ne.s32.totalorder %s1066_s8, %s827_s25  ;;  %p832_p9 = scmp.lt.u32.totalorder %s1066_s8, %s1115_s5 }
 0x1fb   : > { %p833_p0 = scmp.lt.u32.totalorder %s831_s9, %s827_s25  ;;  %p835_p6 = scmp.lt.u32.totalorder %s827_s25, %s1066_s8 }
 0x1fc   : > { %p829_p7 = pnand %p828_p5, %p1125_p11 }
 0x1fd   : > { %p834_p2 = por %p833_p0, %p832_p9 }
 0x1fe   : > { %p830_p8 = pneg %p829_p7 }
 0x1ff   : > { %p836_p12 = por %p835_p6, %p834_p2 }
 0x201   : > { %p837_p13 = pnand %p836_p12, %p830_p8 }
 0x203   : > { %840 = shalt.err (!%p837_p13)
}
 0x204   : > { %732 = dma.vmem_to_hbm [thread:$0]  (%p1125_p11), %s1068_s23, 512, %s1066_s8, %s606_s22  }
 0x205 PF: > { %s632_s13 = sand.u32 1, %s867_s18   ;;  %p1126_p4 = scmp.ne.s32.totalorder %s1120_s6, 0 }
 0x206   : > { %p1127_p10 = scmp.ge.s32.totalorder %s879_s21, 2  ;;  %s633_s17 = scalar_lea.sflag [#allocation4], %s632_s13 }
 0x208   : > { %p739_p1 = pnand %p1127_p10, %p1126_p4 }
 0x20a   : > { %862 = dma.done.wait (!%p739_p1), %s633_s17, 512  }
 0x20b   : > { %864 = vsyncadd (!%p739_p1), %s633_s17, 4294966784  ;;  %p18_p3 = scmp.ge.s32.totalorder %s944_s24, 4   ;;  %s1128_s18 = smov %s871_s19 }
 0x20c   : > { %s1129_s19 = smov %s875_s20  ;;  %s1130_s20 = smov %s956_s27 }
 0x20d   : > { %s1131_s21 = smov %s944_s24  ;;  %20 = sbr.rel (!%p18_p3) target bundleno = 5 (0x5), region = 85 }
 0x214   :  { %638 = vsyncpa [#allocation3], 1 }
 0x215   :  { %640 = vsyncpa [#allocation3 + $0x1], 1 }
 0x216   :  { %641 = vsyncpa [#allocation4], 1 }
 0x217   :  { %643 = vsyncpa [#allocation4 + $0x1], 1 }

</bundles_post_ra>
